<compile_context>
chip_gen: v6e
topology: v6e:2x2x1
jax: 0.10.0
libtpu: 0.0.40
codegen_flags: <defaults>
</compile_context>

<pallas_src>
import functools

import jax
import jax.numpy as jnp
from jax import lax
from jax.experimental import pallas as pl
from jax.experimental.pallas import tpu as pltpu


def _round_up(x, m):
    return (x + m - 1) // m * m


def _bag_min_kernel(y_ref, out_ref, min_ref, *, tn, n_total, nk_per, needs_mask):
    # y_ref  : (TB, TN)      instance probabilities, native dtype
    # out_ref: (1, 1, 1, TB) per-(bag block, split) minima, f32, lane-dense
    # min_ref: (TB, 128)     running per-bag minimum, input's native dtype
    s = pl.program_id(1)           # instance-axis split (megacore partition)
    k = pl.program_id(2)           # instance block within this split

    @pl.when(k == 0)
    def _init():
        min_ref[...] = jnp.full(min_ref.shape, jnp.inf, dtype=min_ref.dtype)

    acc = min_ref[...]                                          # (TB, 128)
    if needs_mask:
        lane = lax.broadcasted_iota(jnp.int32, min_ref.shape, 1)
        base = (s * nk_per + k) * tn                            # logical column offset

    # VPU-only accumulation over 128-lane chunks sliced straight from the ref
    # (no full-tile load, no full-tile f32 materialization).
    for c in range(tn // 128):
        chunk = y_ref[:, c * 128:(c + 1) * 128].astype(min_ref.dtype)
        if needs_mask:
            col = lane + (base + c * 128)
            chunk = jnp.where(col < n_total, chunk, jnp.inf)    # +inf = min identity
        acc = jnp.minimum(acc, chunk)
    min_ref[...] = acc

    @pl.when(k == pl.num_programs(2) - 1)
    def _finalize():
        # One tile-aligned XLU transpose + cross-sublane min per (bag block,
        # split); amortized over all k steps -> effectively free filler.
        mt = jnp.transpose(min_ref[...].astype(jnp.float32))    # (128, TB)
        p = jnp.min(mt, axis=0, keepdims=True)                  # (1, TB)
        out_ref[...] = p.reshape(out_ref.shape)


def bag_loss(y_pred, label, *, tb=128, tn=8192, nsplit=None):
    """y_pred: (B, N) probabilities in [0, 1]; label: (B,) targets in [0, 1]."""
    B, N = y_pred.shape

    TB = min(tb, _round_up(B, 8))        # sublane dim: multiple of 8
    TN = min(tn, _round_up(N, 128))      # lane dim: multiple of 128
    nb = pl.cdiv(B, TB)
    nk = pl.cdiv(N, TN)

    # Split the instance (reduction) axis so both v7x TensorCores stream HBM
    # even when nb == 1.  Harmless (pure grid reshape) on single-TC chips.
    if nsplit is None:
        nsplit = 2 if nk >= 2 else 1
    nsplit = max(1, min(nsplit, nk))
    nk_per = pl.cdiv(nk, nsplit)

    # Accumulate the min in the input's native dtype (min selection is exact);
    # on v5e (no bf16 VALU) the compiler casts per chunk, never a full tile.
    acc_dtype = y_pred.dtype if jnp.issubdtype(y_pred.dtype, jnp.floating) \
        else jnp.float32

    needs_mask = (nsplit * nk_per * TN) != N

    if nk % nsplit == 0:
        y_index_map = lambda i, s, k: (i, s * nk_per + k)
    else:
        # Clamp the padding block(s) of the last split; their lanes are fully
        # masked to +inf in-kernel, so the (re-read) data is irrelevant.
        last_blk = nk - 1
        y_index_map = lambda i, s, k: (i, jnp.minimum(s * nk_per + k, last_blk))

    mins = pl.pallas_call(
        functools.partial(_bag_min_kernel, tn=TN, n_total=N,
                          nk_per=nk_per, needs_mask=needs_mask),
        out_shape=jax.ShapeDtypeStruct((nb, nsplit, 1, TB), jnp.float32),
        grid=(nb, nsplit, nk_per),
        in_specs=[pl.BlockSpec((TB, TN), y_index_map)],
        out_specs=pl.BlockSpec((1, 1, 1, TB), lambda i, s, k: (i, s, 0, 0)),
        scratch_shapes=[pltpu.VMEM((TB, 128), acc_dtype)],
        compiler_params=pltpu.CompilerParams(
            dimension_semantics=("parallel", "parallel", "arbitrary")),
    )(y_pred)

    # Combine per-split partial minima, drop padded bag rows, then apply
    # PyTorch BCELoss (soft-label form, each log term clamped at -100).
    p = jnp.min(mins, axis=1).reshape(nb * TB)[:B]              # (B,) f32
    y = label.astype(jnp.float32).reshape(-1)
    log_p = jnp.maximum(jnp.log(p), -100.0)
    log_1mp = jnp.maximum(jnp.log(1.0 - p), -100.0)
    return jnp.mean(-(y * log_p + (1.0 - y) * log_1mp))        # reduction='mean'


def _bag_loss_ref(y_pred, label):
    p = jnp.min(y_pred.astype(jnp.float32), axis=1)
    y = label.astype(jnp.float32).reshape(-1)
    log_p = jnp.maximum(jnp.log(p), -100.0)
    log_1mp = jnp.maximum(jnp.log(1.0 - p), -100.0)
    return jnp.mean(-(y * log_p + (1.0 - y) * log_1mp))


if __name__ == "__main__":
    key = jax.random.PRNGKey(0)
    k1, k2, k3, k4, k5, k6 = jax.random.split(key, 6)

    # Primary small test: 2 bags x 8 instance probabilities (MIL forward shape).
    B, N = 2, 8
    y_pred = jax.nn.sigmoid(jax.random.normal(k1, (B, N), dtype=jnp.float32))
    label = jax.random.bernoulli(k2, 0.5, (B,)).astype(jnp.float32)
    loss = bag_loss(y_pred, label)
    jax.block_until_ready(loss)
    ref = _bag_loss_ref(y_pred, label)
    assert jnp.allclose(loss, ref, atol=1e-5, rtol=1e-5), (loss, ref)

    # Ragged/tiled path: multiple instance blocks, nsplit=2 with a clamped
    # padding block, ragged B and N handled with zero wrapper-side padding.
    B2, N2 = 12, 700
    y2 = jax.nn.sigmoid(jax.random.normal(k3, (B2, N2), dtype=jnp.float32))
    l2 = jax.random.bernoulli(k4, 0.5, (B2,)).astype(jnp.float32)
    loss2 = bag_loss(y2, l2, tn=256)
    jax.block_until_ready(loss2)
    ref2 = _bag_loss_ref(y2, l2)
    assert jnp.allclose(loss2, ref2, atol=1e-5, rtol=1e-5), (loss2, ref2)

    # Native-dtype (bf16) accumulation path + soft targets.
    B3, N3 = 4, 300
    y3 = jax.nn.sigmoid(
        jax.random.normal(k5, (B3, N3), dtype=jnp.float32)).astype(jnp.bfloat16)
    l3 = jax.random.uniform(k6, (B3,), dtype=jnp.float32)       # soft labels
    loss3 = bag_loss(y3, l3)
    jax.block_until_ready(loss3)
    ref3 = _bag_loss_ref(y3, l3)
    assert jnp.allclose(loss3, ref3, atol=1e-5, rtol=1e-5), (loss3, ref3)

    print("KERNEL_OK")
</pallas_src>

<mosaic_0001>
module attributes {stable_mosaic.version = 11 : i64} {
  func.func @_bag_min_kernel(%arg0: i32, %arg1: i32, %arg2: i32, %arg3: memref<8x128xf32, #tpu.memory_space<vmem>>, %arg4: memref<1x1x1x8xf32, #tpu.memory_space<vmem>>, %arg5: memref<8x128xf32, #tpu.memory_space<vmem>>) attributes {dimension_semantics = [#tpu.dimension_semantics<parallel>, #tpu.dimension_semantics<parallel>, #tpu.dimension_semantics<arbitrary>], iteration_bounds = array<i64: 1, 1, 1>, scalar_prefetch = 0 : i64, scratch_operands = 1 : i64, tpu.core_type = #tpu.core_type<tc>, window_params = [{transform_indices = @transform_0, window_bounds = array<i64: 8, 128>}, {transform_indices = @transform_1, window_bounds = array<i64: 1, 1, 1, 8>}]} {
    %c0_i32 = arith.constant 0 : i32
    %0 = arith.cmpi eq, %arg2, %c0_i32 : i32
    %1 = arith.extui %0 : i1 to i32
    %c0_i32_0 = arith.constant 0 : i32
    %2 = arith.cmpi ne, %1, %c0_i32_0 : i32
    scf.if %2 {
      %cst_9 = arith.constant 0x7F800000 : f32
      %21 = vector.broadcast %cst_9 : f32 to vector<8x128xf32>
      %c0_10 = arith.constant 0 : index
      %c0_11 = arith.constant 0 : index
      %22 = vector.load %arg5[%c0_10, %c0_11] : memref<8x128xf32, #tpu.memory_space<vmem>>, vector<8x128xf32>
      tpu.vector_store %arg5[%c0_10, %c0_11], %21 {strides = array<i32>} : memref<8x128xf32, #tpu.memory_space<vmem>>, vector<8x128xf32>,
    } else {
    }
    %c0 = arith.constant 0 : index
    %c0_1 = arith.constant 0 : index
    %3 = vector.load %arg5[%c0, %c0_1] : memref<8x128xf32, #tpu.memory_space<vmem>>, vector<8x128xf32>
    %4 = tpu.iota {dimensions = array<i32: 1>} : vector<8x128xi32>
    %c1_i32 = arith.constant 1 : i32
    %5 = arith.muli %arg1, %c1_i32 : i32
    %6 = arith.addi %5, %arg2 : i32
    %c128_i32 = arith.constant 128 : i32
    %7 = arith.muli %6, %c128_i32 : i32
    %c0_2 = arith.constant 0 : index
    %c0_3 = arith.constant 0 : index
    %8 = vector.load %arg3[%c0_2, %c0_3] : memref<8x128xf32, #tpu.memory_space<vmem>>, vector<8x128xf32>
    %c0_i32_4 = arith.constant 0 : i32
    %9 = arith.addi %7, %c0_i32_4 : i32
    %10 = vector.broadcast %9 : i32 to vector<8x128xi32>
    %11 = arith.addi %4, %10 : vector<8x128xi32>
    %c8_i32 = arith.constant 8 : i32
    %12 = vector.broadcast %c8_i32 : i32 to vector<8x128xi32>
    %13 = arith.cmpi slt, %11, %12 : vector<8x128xi32>
    %cst = arith.constant 0x7F800000 : f32
    %14 = vector.broadcast %cst : f32 to vector<8x128xf32>
    %15 = arith.select %13, %8, %14 : vector<8x128xi1>, vector<8x128xf32>
    %16 = arith.minimumf %3, %15 : vector<8x128xf32>
    %c0_5 = arith.constant 0 : index
    %c0_6 = arith.constant 0 : index
    %17 = vector.load %arg5[%c0_5, %c0_6] : memref<8x128xf32, #tpu.memory_space<vmem>>, vector<8x128xf32>
    tpu.vector_store %arg5[%c0_5, %c0_6], %16 {strides = array<i32>} : memref<8x128xf32, #tpu.memory_space<vmem>>, vector<8x128xf32>,
    %c0_i32_7 = arith.constant 0 : i32
    %18 = arith.cmpi eq, %arg2, %c0_i32_7 : i32
    %19 = arith.extui %18 : i1 to i32
    %c0_i32_8 = arith.constant 0 : i32
    %20 = arith.cmpi ne, %19, %c0_i32_8 : i32
    scf.if %20 {
      %c0_9 = arith.constant 0 : index
      %c0_10 = arith.constant 0 : index
      %21 = vector.load %arg5[%c0_9, %c0_10] : memref<8x128xf32, #tpu.memory_space<vmem>>, vector<8x128xf32>
      %22 = tpu.transpose %21, [1, 0] : vector<8x128xf32> -> vector<128x8xf32>
      %cst_11 = arith.constant dense<0x7F800000> : vector<8xf32>
      %23 = vector.multi_reduction <minimumf>, %22, %cst_11 [0] : vector<128x8xf32> to vector<8xf32>
      %24 = vector.shape_cast %23 : vector<8xf32> to vector<1x8xf32>
      %25 = vector.shape_cast %24 : vector<1x8xf32> to vector<1x1x1x8xf32>
      %c0_12 = arith.constant 0 : index
      %c0_13 = arith.constant 0 : index
      %c0_14 = arith.constant 0 : index
      %c0_15 = arith.constant 0 : index
      %26 = vector.load %arg4[%c0_12, %c0_13, %c0_14, %c0_15] : memref<1x1x1x8xf32, #tpu.memory_space<vmem>>, vector<1x1x1x8xf32>
      tpu.vector_store %arg4[%c0_12, %c0_13, %c0_14, %c0_15], %25 {strides = array<i32>} : memref<1x1x1x8xf32, #tpu.memory_space<vmem>>, vector<1x1x1x8xf32>,
    } else {
    }
    return
  }
  func.func @transform_0(%arg0: i32, %arg1: i32, %arg2: i32) -> (i32, i32) {
    %c1_i32 = arith.constant 1 : i32
    %0 = arith.muli %arg1, %c1_i32 : i32
    %1 = arith.addi %0, %arg2 : i32
    %c0_i32 = arith.constant 0 : i32
    return %arg0, %1 : i32, i32
  }
  func.func @transform_1(%arg0: i32, %arg1: i32, %arg2: i32) -> (i32, i32, i32, i32) {
    %c0_i32 = arith.constant 0 : i32
    %c0_i32_0 = arith.constant 0 : i32
    %c0_i32_1 = arith.constant 0 : i32
    return %arg0, %arg1, %c0_i32, %c0_i32_0 : i32, i32, i32, i32
  }
}

</mosaic_0001>

<bundles_post_ra>
// kernel: tpu_custom_call.1
= control target key start
LH: loop header
LB: loop body
LE: loop exit
PB: predicated region body
PF: predicated region fallthrough
CT: control target
= control target key end

     0   :  { %6 = vsyncpa [#allocation4], 0  ;;  %s220_s0 = inlined_call_operand.hbm [shape: f32[2,8], index: 0, kind: input, shape index: {}]   ;;  %s221_s1 = inlined_call_operand.hbm [shape: f32[1,1,1,8], index: 1, kind: output, shape index: {}]  }
   0x1   :  { %7 = vsyncpa [#allocation5], 0 }
   0x2   :  { %13 = vsyncadd [#allocation4], 96  ;;  %s184_s6 = smov [#allocation3]  }
   0x3   :  { %s16_s7 = sshll.u32 %s184_s6, 4  ;;  %s17_s7 = int_to_ptr.vmem [resolvable:$true] %s16_s7 }
   0x4   :  { %s148_s8 = scalar_lea.vmem %s17_s7, 32  ;;  %s152_s9 = scalar_lea.vmem %s17_s7, 128 }
   0x5   :  { %p149_p0 = scmp.ne.s32.totalorder %s17_s7, %s148_s8  ;;  %p153_p1 = scmp.lt.s32.totalorder %s17_s7, %s17_s7 }
   0x6   :  { %p154_p2 = scmp.lt.s32.totalorder %s152_s9, %s148_s8 }
   0x8   :  { %p155_p3 = por %p154_p2, %p153_p1 }
   0xa   :  { %p156_p4 = pnand %p155_p3, %p149_p0 }
   0xc   :  { %159 = shalt.err (!%p156_p4)
}
   0xd   :  { %s185_s10 = smov 32   ;;  %s186_s11 = smov 2  }
   0xe   :  { %22 = dma.hbm_to_vmem [thread:$0]  %s220_s0, 32, %s17_s7, [#allocation4], %s185_s10, %s185_s10, %s186_s11  }
   0xf   :  { %180 = dma.done.wait [#allocation4], 128  }
  0x10   :  { %181 = vsyncadd [#allocation4], 4294967168  ;;  %v33_v0 = vlaneseq  ;;  %v37_v2 = vld [vmem:[#allocation3] sm:$0xff]  ;;  %vm80_vm1 = vcmask 64512   ;;  %s187_s0 = smov [#allocation6]   ;;  %vm118_vm2 = vcmask 57344  }
  0x11   :  { %s126_s14 = sshll.u32 %s187_s0, 4  ;;  %s127_s14 = int_to_ptr.vmem [resolvable:$true] %s126_s14 }
  0x12   :  { %v34_v1 = vand.u32 127, %v33_v0  ;;  %s160_s15 = scalar_lea.vmem %s127_s14, 16  ;;  %s164_s16 = scalar_lea.vmem %s127_s14, 32 }
  0x13   :  { %p161_p5 = scmp.ne.s32.totalorder %s127_s14, %s160_s15  ;;  %p165_p6 = scmp.lt.s32.totalorder %s127_s14, %s127_s14 }
  0x14   :  { %vm40_vm0 = vcmp.lt.s32.totalorder %v34_v1, 8  ;;  %p166_p7 = scmp.lt.s32.totalorder %s164_s16, %s160_s15 }
  0x15   :  { %v41_v3 = vsel %vm40_vm0, %v37_v2, inf }
  0x16   :  { %48 = vxpose.xlu0.b32.start.end [1/1] (short) %v41_v3, 128  ;;  %p167_p8 = por %p166_p7, %p165_p6 }
  0x18   :  { %p168_p9 = pnand %p167_p8, %p161_p5 }
  0x92   :  { %v64_v4 = vpop.trf.xlu0 }
  0x93   :  { %v81_v24 = vsel %vm80_vm1, %v64_v4, inf }
  0x96   :  { %v65_v5 = vpop.trf.xlu0 }
  0x97   :  { %v82_v19 = vsel %vm80_vm1, %v65_v5, inf }
  0x9a   :  { %v66_v6 = vpop.trf.xlu0 }
  0x9b   :  { %v83_v25 = vsel %vm80_vm1, %v66_v6, inf }
  0x9e   :  { %v67_v7 = vpop.trf.xlu0 }
  0x9f   :  { %v84_v26 = vsel %vm80_vm1, %v67_v7, inf }
  0xa2   :  { %v68_v8 = vpop.trf.xlu0 }
  0xa3   :  { %v85_v20 = vsel %vm80_vm1, %v68_v8, inf }
  0xa4   :  { %v86_v33 = vmin.f32 %v81_v24, %v85_v20 }
  0xa6   :  { %v69_v9 = vpop.trf.xlu0 }
  0xa7   :  { %v87_v18 = vsel %vm80_vm1, %v69_v9, inf }
  0xa8   :  { %v88_v27 = vmin.f32 %v82_v19, %v87_v18 }
  0xaa   :  { %v70_v10 = vpop.trf.xlu0 }
  0xab   :  { %v89_v21 = vsel %vm80_vm1, %v70_v10, inf }
  0xac   :  { %v90_v34 = vmin.f32 %v83_v25, %v89_v21 }
  0xae   :  { %v71_v11 = vpop.trf.xlu0 }
  0xaf   :  { %v91_v22 = vsel %vm80_vm1, %v71_v11, inf }
  0xb0   :  { %v92_v35 = vmin.f32 %v84_v26, %v91_v22 }
  0xb2   :  { %v72_v12 = vpop.trf.xlu0 }
  0xb3   :  { %v93_v29 = vsel %vm80_vm1, %v72_v12, inf }
  0xb4   :  { %v94_v39 = vmin.f32 %v86_v33, %v93_v29 }
  0xb6   :  { %v73_v13 = vpop.trf.xlu0 }
  0xb7   :  { %v95_v23 = vsel %vm80_vm1, %v73_v13, inf }
  0xb8   :  { %v96_v36 = vmin.f32 %v88_v27, %v95_v23 }
  0xba   :  { %v74_v14 = vpop.trf.xlu0 }
  0xbb   :  { %v97_v30 = vsel %vm80_vm1, %v74_v14, inf }
  0xbc   :  { %v98_v40 = vmin.f32 %v90_v34, %v97_v30 }
  0xbe   :  { %v75_v15 = vpop.trf.xlu0 }
  0xbf   :  { %v99_v31 = vsel %vm80_vm1, %v75_v15, inf }
  0xc0   :  { %v100_v41 = vmin.f32 %v92_v35, %v99_v31 }
  0xc2   :  { %v76_v16 = vpop.trf.xlu0 }
  0xc3   :  { %v101_v37 = vsel %vm80_vm1, %v76_v16, inf }
  0xc4   :  { %v102_v45 = vmin.f32 %v94_v39, %v101_v37 }
  0xc6   :  { %v77_v17 = vpop.trf.xlu0 }
  0xc7   :  { %v103_v32 = vsel %vm80_vm1, %v77_v17, inf }
  0xc8   :  { %v104_v42 = vmin.f32 %v96_v36, %v103_v32 }
  0xca   :  { %v78_v28 = vpop.trf.xlu0  ;;  %v109_v48 = vmin.f32 %v102_v45, %v104_v42 }
  0xcb   :  { %v105_v38 = vsel %vm80_vm1, %v78_v28, inf }
  0xcc   :  { %v106_v46 = vmin.f32 %v98_v40, %v105_v38 }
  0xce   :  { %v79_v43 = vpop.trf.xlu0 }
  0xcf   :  { %v107_v44 = vsel %vm80_vm1, %v79_v43, inf }
  0xd0   :  { %v108_v47 = vmin.f32 %v100_v41, %v107_v44 }
  0xd2   :  { %v110_v49 = vmin.f32 %v106_v46, %v108_v47 }
  0xd4   :  { %v111_v50 = vmin.f32 %v109_v48, %v110_v49 }
  0xd6   :  { %v112_v51 = vrot.slane %v111_v50, 4 }
  0xd8   :  { %v113_v52 = vmin.f32 %v111_v50, %v112_v51 }
  0xda   :  { %v114_v53 = vrot.slane %v113_v52, 2 }
  0xdc   :  { %v115_v54 = vmin.f32 %v113_v52, %v114_v53 }
  0xde   :  { %v116_v55 = vrot.slane %v115_v54, 1 }
  0xe0   :  { %v117_v56 = vmin.f32 %v115_v54, %v116_v55 }
  0xe2   :  { %119 = vst.msk [vmem:[#allocation6] sm:$0x1] %vm118_vm2, %v117_v56 }
  0xe3   :  { %171 = shalt.err (!%p168_p9)
}
  0xe4   :  { %129 = dma.vmem_to_hbm [thread:$0]  %s127_s14, 16, %s221_s1, [#allocation5]  }
  0xe5   :  { %182 = dma.done.wait [#allocation5], 16  }
  0xe6   :  { %183 = vsyncadd [#allocation5], 4294967280 }
  0xe7   :  { %133 = vsyncpa [#allocation4], 1 }
  0xe8   :  { %134 = vsyncpa [#allocation5], 1 }

</bundles_post_ra>
